<compile_context>
chip_gen: v5e
topology: v5e:2x2
jax: 0.10.0
libtpu: 0.0.40
codegen_flags: <defaults>
</compile_context>

<pallas_src>
import functools
import math

import jax
import jax.numpy as jnp
from jax.experimental import pallas as pl
from jax.experimental.pallas import tpu as pltpu


# ----------------------------------------------------------------------------
# Module hyper-parameter (matches ECA_block.__init__)
# ----------------------------------------------------------------------------
def _eca_kernel_size(channel, b=1, gamma=2):
    k = int(abs((math.log(channel, 2) + b) / gamma))
    return k if k % 2 else k + 1


# ----------------------------------------------------------------------------
# Hardware introspection (best-effort, used only for budgets / path selection)
# ----------------------------------------------------------------------------
def _device_kind():
    try:
        return jax.devices()[0].device_kind.lower()
    except Exception:
        return ""


def _tpu_vmem_capacity():
    try:
        cap = getattr(pltpu.get_tpu_info(), "vmem_capacity_bytes", None)
        if cap:
            return int(cap)
    except Exception:
        pass
    return 128 << 20


def _tensorcores_per_chip():
    return 2 if "v7" in _device_kind() else 1


def _has_bf16_valu():
    kind = _device_kind()
    return any(t in kind for t in ("v6", "trillium", "v7"))


def _vmem_plan():
    """(tile-sizing budget, hard cap for vmem_limit_bytes) for this chip."""
    phys = _tpu_vmem_capacity()
    if phys <= (80 << 20):          # v7x-class: 64 MiB VMEM per TensorCore
        limit_cap = 52 << 20
    else:                           # v5e / v6e: 128 MiB physical VMEM
        limit_cap = 110 << 20
    return limit_cap - (6 << 20), limit_cap


def _vmem_limit(needed_bytes, limit_cap):
    return int(min(max(int(needed_bytes) + (4 << 20), 32 << 20), limit_cap))


# ----------------------------------------------------------------------------
# In-kernel channel attention: sigmoid(conv1d_same(mean, w))
# ----------------------------------------------------------------------------
def _attention_rolled(mean, w_ref, k):
    """k-tap conv as rolled multiply-adds.  mean: (bt, C), C % 128 == 0."""
    C = mean.shape[-1]
    pad = (k - 1) // 2
    ch = jax.lax.broadcasted_iota(jnp.int32, mean.shape, 1)
    conv = w_ref[pad] * mean                       # center tap (d == 0)
    for t in range(k):
        d = t - pad
        if d == 0 or abs(d) >= C:
            continue
        # shifted[c] = mean[c + d]  (pltpu.roll follows jnp.roll semantics)
        rolled = pltpu.roll(mean, shift=(-d) % C, axis=1)
        valid = (ch + d >= 0) & (ch + d < C)       # zero-pad boundary handling
        conv = conv + w_ref[t] * jnp.where(valid, rolled, 0.0)
    return jax.nn.sigmoid(conv)


def _attention_small_c(mean, w_ref, k):
    """Small / unaligned C: build the banded matrix in vregs (no HBM matrix)."""
    C = mean.shape[-1]
    pad = (k - 1) // 2
    ci = jax.lax.broadcasted_iota(jnp.int32, (C, C), 0)     # input channel
    co = jax.lax.broadcasted_iota(jnp.int32, (C, C), 1)     # output channel
    tap = ci - co + pad                                     # weight index
    mt = jnp.zeros((C, C), jnp.float32)                     # transposed band
    for t in range(k):
        mt = jnp.where(tap == t, w_ref[t], mt)
    conv = jnp.dot(mean, mt, preferred_element_type=jnp.float32)
    return jax.nn.sigmoid(conv)


def _channel_attention(mean, w_ref, k):
    C = mean.shape[-1]
    if C % 128 == 0 and C >= 128:
        return _attention_rolled(mean, w_ref, k)
    return _attention_small_c(mean, w_ref, k)


# ----------------------------------------------------------------------------
# Kernels
# ----------------------------------------------------------------------------
def _eca_fused_kernel(w_ref, x_ref, o_ref, *, hw, k, chunk_cols, n_chunks,
                      bf16_math):
    """One pass per (bt, C, HW) block: pool + conv + sigmoid + rescale,
    streamed over HW chunks so no full-tile f32 temporary is held live."""
    bt, C = x_ref.shape[0], x_ref.shape[1]

    # ---- pooling: per-channel sums, streamed over HW chunks ----------------
    if n_chunks == 1:
        total = jnp.sum(x_ref[...].astype(jnp.float32), axis=-1)     # (bt, C)
    else:
        def acc_body(i, acc):
            start = pl.multiple_of(i * chunk_cols, chunk_cols)
            xs = x_ref[:, :, pl.ds(start, chunk_cols)]
            return acc + jnp.sum(xs.astype(jnp.float32), axis=-1)
        total = jax.lax.fori_loop(0, n_chunks, acc_body,
                                  jnp.zeros((bt, C), jnp.float32))

    mean = total * (1.0 / hw)
    attn = _channel_attention(mean, w_ref, k)                         # (bt, C)

    if bf16_math:
        attn_s = attn.astype(o_ref.dtype)[:, :, None]
    else:
        attn_s = attn[:, :, None]

    def scale_chunk(xs):
        if bf16_math:
            return xs * attn_s
        return (xs.astype(jnp.float32) * attn_s).astype(o_ref.dtype)

    # ---- rescale: chunk-wise stores -----------------------------------------
    if n_chunks == 1:
        o_ref[...] = scale_chunk(x_ref[...])
    else:
        def out_body(i, carry):
            start = pl.multiple_of(i * chunk_cols, chunk_cols)
            sl = pl.ds(start, chunk_cols)
            o_ref[:, :, sl] = scale_chunk(x_ref[:, :, sl])
            return carry
        jax.lax.fori_loop(0, n_chunks, out_body, 0)


def _eca_attn_kernel(w_ref, x_ref, attn_ref, sum_sc, *, hw, k, thw, needs_mask):
    """Two-pass / pass 1: accumulate channel sums over HW tiles, finish with
    conv + sigmoid.  Tail tile (when HW % thw != 0) is masked to zero."""
    h = pl.program_id(1)

    @pl.when(h == 0)
    def _():
        sum_sc[...] = jnp.zeros_like(sum_sc)

    xs = x_ref[...].astype(jnp.float32)                               # (1,C,thw)
    if needs_mask:
        col = h * thw + jax.lax.broadcasted_iota(jnp.int32, xs.shape, 2)
        xs = jnp.where(col < hw, xs, 0.0)
    sum_sc[...] += jnp.sum(xs, axis=-1)                               # (1, C)

    @pl.when(h == pl.num_programs(1) - 1)
    def _():
        mean = sum_sc[...] * (1.0 / hw)
        attn_ref[...] = _channel_attention(mean, w_ref, k)[:, :, None]


def _eca_scale_kernel(x_ref, attn_ref, o_ref, *, bf16_math):
    """Two-pass / pass 2: out = x * attn (broadcast over the spatial tile).
    Tail-tile writes past HW are dropped by Pallas's bounded writeback."""
    if bf16_math:
        o_ref[...] = x_ref[...] * attn_ref[...].astype(o_ref.dtype)
    else:
        o_ref[...] = (x_ref[...].astype(jnp.float32) * attn_ref[...]
                      ).astype(o_ref.dtype)


# ----------------------------------------------------------------------------
# Host-side tiling / VMEM budgeting helpers
# ----------------------------------------------------------------------------
def _pick_in_kernel_chunk(HW, target=2048):
    """Chunk size for in-kernel HW streaming (128-multiple divisor of HW)."""
    if HW <= target:
        return HW, 1
    best = None
    t = 128
    while t <= target:
        if HW % t == 0:
            best = t
        t += 128
    if best is None:
        return HW, 1
    return best, HW // best


def _pick_batch_tile(B, per_sample_bytes, budget_bytes, two_cores):
    cap = max(1, int(budget_bytes) // max(int(per_sample_bytes), 1))
    if two_cores and B >= 2:
        cap = min(cap, max(1, B // 2))   # keep >= 2 grid steps for v7x's 2 TCs
    bt = 1
    for d in range(1, B + 1):
        if B % d == 0 and d <= cap:
            bt = d
    return bt


def _pick_hw_tile(HW, per_col_bytes, budget_bytes):
    """128-multiple spatial tile fitting the per-step budget; prefers an exact
    divisor of HW (no masked tail), otherwise uses a cdiv grid with a tail."""
    cap = int(budget_bytes) // max(int(per_col_bytes), 1)
    cap = max(128, (cap // 128) * 128)
    cap = min(cap, max(128, (HW // 128) * 128))
    best = None
    t = 128
    while t <= cap:
        if HW % t == 0:
            best = t
        t += 128
    return best if best is not None else cap


# ----------------------------------------------------------------------------
# pallas_call wrappers
# ----------------------------------------------------------------------------
def _eca_fused(x_flat, w, bt, chunk_cols, n_chunks, bf16_math, vmem_limit):
    B, C, HW = x_flat.shape
    k = w.shape[0]
    kernel = functools.partial(_eca_fused_kernel, hw=HW, k=k,
                               chunk_cols=chunk_cols, n_chunks=n_chunks,
                               bf16_math=bf16_math)
    return pl.pallas_call(
        kernel,
        out_shape=jax.ShapeDtypeStruct((B, C, HW), x_flat.dtype),
        grid_spec=pltpu.PrefetchScalarGridSpec(
            num_scalar_prefetch=0,
            grid=(B // bt,),
            in_specs=[
                pl.BlockSpec(memory_space=pltpu.MemorySpace.SMEM),  # (k,) weights
                pl.BlockSpec((bt, C, HW), lambda b: (b, 0, 0)),
            ],
            out_specs=pl.BlockSpec((bt, C, HW), lambda b: (b, 0, 0)),
        ),
        compiler_params=pltpu.CompilerParams(
            dimension_semantics=("parallel",),
            vmem_limit_bytes=vmem_limit),
    )(w, x_flat)


def _eca_attention(x_flat, w, thw, vmem_limit):
    B, C, HW = x_flat.shape
    k = w.shape[0]
    n_h = (HW + thw - 1) // thw
    kernel = functools.partial(_eca_attn_kernel, hw=HW, k=k, thw=thw,
                               needs_mask=(HW % thw != 0))
    return pl.pallas_call(
        kernel,
        out_shape=jax.ShapeDtypeStruct((B, C, 1), jnp.float32),
        grid_spec=pltpu.PrefetchScalarGridSpec(
            num_scalar_prefetch=0,
            grid=(B, n_h),
            in_specs=[
                pl.BlockSpec(memory_space=pltpu.MemorySpace.SMEM),  # (k,) weights
                pl.BlockSpec((1, C, thw), lambda b, h: (b, 0, h)),
            ],
            out_specs=pl.BlockSpec((1, C, 1), lambda b, h: (b, 0, 0)),
            scratch_shapes=[pltpu.VMEM((1, C), jnp.float32)],
        ),
        compiler_params=pltpu.CompilerParams(
            dimension_semantics=("parallel", "arbitrary"),
            vmem_limit_bytes=vmem_limit),
    )(w, x_flat)


def _eca_rescale(x_flat, attn, thw, bf16_math, vmem_limit):
    B, C, HW = x_flat.shape
    n_h = (HW + thw - 1) // thw
    kernel = functools.partial(_eca_scale_kernel, bf16_math=bf16_math)
    return pl.pallas_call(
        kernel,
        out_shape=jax.ShapeDtypeStruct((B, C, HW), x_flat.dtype),
        grid_spec=pltpu.PrefetchScalarGridSpec(
            num_scalar_prefetch=0,
            grid=(B, n_h),
            in_specs=[
                pl.BlockSpec((1, C, thw), lambda b, h: (b, 0, h)),
                pl.BlockSpec((1, C, 1), lambda b, h: (b, 0, 0)),
            ],
            out_specs=pl.BlockSpec((1, C, thw), lambda b, h: (b, 0, h)),
        ),
        compiler_params=pltpu.CompilerParams(
            dimension_semantics=("parallel", "parallel"),
            vmem_limit_bytes=vmem_limit),
    )(x_flat, attn)


def eca_block(x, conv_weight, *, vmem_budget_bytes=None):
    """ECA forward.  x: (B, C, H, W) float32/bfloat16, conv_weight: (k,) (or (1,1,k))."""
    B, C, H, W = x.shape
    HW = H * W
    itemsize = x.dtype.itemsize
    x_flat = x.reshape(B, C, HW)
    w = jnp.asarray(conv_weight, jnp.float32).reshape(-1)

    budget, limit_cap = _vmem_plan()
    if vmem_budget_bytes is not None:
        budget = int(vmem_budget_bytes)
    two_cores = _tensorcores_per_chip() >= 2
    bf16_math = (x.dtype == jnp.bfloat16) and _has_bf16_valu()

    chunk_cols, n_chunks = _pick_in_kernel_chunk(HW)
    # Fused-path per-sample VMEM: double-buffered input + output blocks plus
    # the transient f32 chunk / (bt, C) vectors.
    per_sample = 4 * C * HW * itemsize + 4 * C * chunk_cols + 16 * C

    use_fused = (per_sample <= budget) or (HW <= 128)
    if use_fused and two_cores and B == 1 and C * HW * itemsize >= (2 << 20):
        # v7x: a single fused grid step would leave one TensorCore idle;
        # the two-pass rescale grid parallelises over HW instead.
        use_fused = False

    if use_fused:
        bt = _pick_batch_tile(B, per_sample, budget, two_cores)
        out_flat = _eca_fused(x_flat, w, bt, chunk_cols, n_chunks, bf16_math,
                              _vmem_limit(bt * per_sample, limit_cap))
    else:
        # Pass 1 (reduction) only streams the input -> it gets a larger tile
        # than pass 2 (read + write).
        per_col1 = 2 * C * itemsize + 4 * C + 8
        thw1 = _pick_hw_tile(HW, per_col1, budget)
        per_col2 = 4 * C * itemsize + (C * itemsize if bf16_math else 4 * C) + 8
        thw2 = _pick_hw_tile(HW, per_col2, budget)
        attn = _eca_attention(x_flat, w, thw1,
                              _vmem_limit(per_col1 * thw1, limit_cap))
        out_flat = _eca_rescale(x_flat, attn, thw2, bf16_math,
                                _vmem_limit(per_col2 * thw2, limit_cap))

    return out_flat.reshape(B, C, H, W)


# ----------------------------------------------------------------------------
# Self test
# ----------------------------------------------------------------------------
def _reference(x, w):
    """Pure-JAX reference: exact zero-padded 'same' conv1d over channels."""
    B, C, H, W = x.shape
    k = w.shape[0]
    pad = (k - 1) // 2
    mean = jnp.mean(x.astype(jnp.float32), axis=(2, 3))            # (B, C)
    mean_p = jnp.pad(mean, ((0, 0), (pad, pad)))
    conv = sum(w[t] * mean_p[:, t:t + C] for t in range(k))
    attn = jax.nn.sigmoid(conv)
    return x.astype(jnp.float32) * attn[:, :, None, None]


if __name__ == "__main__":
    key = jax.random.PRNGKey(0)

    def run_case(B, C, H, W, dtype, budget=None, atol=1e-3, rtol=1e-3):
        k = _eca_kernel_size(C)
        kx, kw = jax.random.split(jax.random.fold_in(key, C * 10007 + H))
        x = jax.random.normal(kx, (B, C, H, W), dtype=jnp.float32)
        wgt = jax.random.normal(kw, (k,), dtype=jnp.float32) * 0.5
        xd = x.astype(dtype)
        if budget is None:
            out = eca_block(xd, wgt)
        else:
            out = eca_block(xd, wgt, vmem_budget_bytes=budget)
        jax.block_until_ready(out)
        assert out.shape == xd.shape and out.dtype == xd.dtype
        ref = _reference(xd.astype(jnp.float32), wgt)
        assert jnp.allclose(out.astype(jnp.float32), ref, atol=atol, rtol=rtol), \
            f"mismatch B={B} C={C} H={H} W={W} dtype={dtype} budget={budget}"

    # 1) Fused single-pass path (small-C banded conv), f32.
    run_case(2, 16, 16, 16, jnp.float32)
    # 2) Two-pass path (HW-tiled streaming reduction + rescale), forced.
    run_case(2, 16, 16, 16, jnp.float32, budget=1 << 14)
    # 3) Two-pass path with a masked tail tile (H*W = 196, not a 128 multiple).
    run_case(2, 16, 14, 14, jnp.float32, budget=1 << 14)
    # 4) Lane-aligned channel count -> rolled (XLU) channel conv, fused path.
    run_case(2, 128, 8, 8, jnp.float32, atol=1e-4, rtol=1e-4)
    # 5) Fused path with in-kernel HW chunk streaming (H*W = 4096 -> 2 chunks).
    run_case(2, 16, 64, 64, jnp.float32)
    # 6) bf16 input (dtype-preserving HBM traffic; bf16 rescale on v6e/v7x).
    run_case(2, 16, 16, 16, jnp.bfloat16, atol=3e-2, rtol=3e-2)

    print("KERNEL_OK")
</pallas_src>

<mosaic_0001>
module attributes {stable_mosaic.version = 11 : i64} {
  func.func @_eca_fused_kernel(%arg0: i32, %arg1: memref<3xf32, #tpu.memory_space<smem>>, %arg2: memref<2x16x256xf32, #tpu.memory_space<vmem>>, %arg3: memref<2x16x256xf32, #tpu.memory_space<vmem>>) attributes {dimension_semantics = [#tpu.dimension_semantics<parallel>], iteration_bounds = array<i64: 1>, scalar_prefetch = 0 : i64, scratch_operands = 0 : i64, tpu.core_type = #tpu.core_type<tc>, window_params = [{transform_indices = @transform_0, window_bounds = array<i64: 3>}, {transform_indices = @transform_1, window_bounds = array<i64: 2, 16, 256>}, {transform_indices = @transform_2, window_bounds = array<i64: 2, 16, 256>}]} {
    %c0 = arith.constant 0 : index
    %c0_0 = arith.constant 0 : index
    %c0_1 = arith.constant 0 : index
    %0 = vector.load %arg2[%c0, %c0_0, %c0_1] : memref<2x16x256xf32, #tpu.memory_space<vmem>>, vector<2x16x256xf32>
    %cst = arith.constant dense<0.000000e+00> : vector<2x16xf32>
    %1 = vector.multi_reduction <add>, %0, %cst [2] : vector<2x16x256xf32> to vector<2x16xf32>
    %cst_2 = arith.constant 3.906250e-03 : f32
    %2 = vector.broadcast %cst_2 : f32 to vector<2x16xf32>
    %3 = arith.mulf %1, %2 : vector<2x16xf32>
    %4 = tpu.iota {dimensions = array<i32: 0>} : vector<16x16xi32>
    %5 = tpu.iota {dimensions = array<i32: 1>} : vector<16x16xi32>
    %6 = arith.subi %4, %5 : vector<16x16xi32>
    %c1_i32 = arith.constant 1 : i32
    %7 = vector.broadcast %c1_i32 : i32 to vector<16x16xi32>
    %8 = arith.addi %6, %7 : vector<16x16xi32>
    %cst_3 = arith.constant 0.000000e+00 : f32
    %9 = vector.broadcast %cst_3 : f32 to vector<16x16xf32>
    %c0_i32 = arith.constant 0 : i32
    %10 = vector.broadcast %c0_i32 : i32 to vector<16x16xi32>
    %11 = arith.cmpi eq, %8, %10 : vector<16x16xi32>
    %c0_4 = arith.constant 0 : index
    %12 = memref.load %arg1[%c0_4] : memref<3xf32, #tpu.memory_space<smem>>
    %13 = vector.broadcast %12 : f32 to vector<16x16xf32>
    %14 = arith.select %11, %13, %9 : vector<16x16xi1>, vector<16x16xf32>
    %c1_i32_5 = arith.constant 1 : i32
    %15 = vector.broadcast %c1_i32_5 : i32 to vector<16x16xi32>
    %16 = arith.cmpi eq, %8, %15 : vector<16x16xi32>
    %c1 = arith.constant 1 : index
    %17 = memref.load %arg1[%c1] : memref<3xf32, #tpu.memory_space<smem>>
    %18 = vector.broadcast %17 : f32 to vector<16x16xf32>
    %19 = arith.select %16, %18, %14 : vector<16x16xi1>, vector<16x16xf32>
    %c2_i32 = arith.constant 2 : i32
    %20 = vector.broadcast %c2_i32 : i32 to vector<16x16xi32>
    %21 = arith.cmpi eq, %8, %20 : vector<16x16xi32>
    %c2 = arith.constant 2 : index
    %22 = memref.load %arg1[%c2] : memref<3xf32, #tpu.memory_space<smem>>
    %23 = vector.broadcast %22 : f32 to vector<16x16xf32>
    %24 = arith.select %21, %23, %19 : vector<16x16xi1>, vector<16x16xf32>
    %cst_6 = arith.constant dense<0.000000e+00> : vector<2x16xf32>
    %25 = tpu.matmul %3, %24, %cst_6 {dimension_numbers = #tpu.dot_dimension_numbers<[1], [0], [0], [1], [0, 0, 1, 1], [], []>} : vector<2x16xf32>, vector<16x16xf32>, vector<2x16xf32> -> vector<2x16xf32>
    %26 = arith.negf %25 : vector<2x16xf32>
    %27 = math.exp %26 : vector<2x16xf32>
    %cst_7 = arith.constant 1.000000e+00 : f32
    %28 = vector.broadcast %cst_7 : f32 to vector<2x16xf32>
    %29 = arith.addf %28, %27 : vector<2x16xf32>
    %30 = arith.divf %28, %29 : vector<2x16xf32>
    %31 = vector.shape_cast %30 : vector<2x16xf32> to vector<2x16x1xf32>
    %c0_8 = arith.constant 0 : index
    %c0_9 = arith.constant 0 : index
    %c0_10 = arith.constant 0 : index
    %32 = vector.load %arg2[%c0_8, %c0_9, %c0_10] : memref<2x16x256xf32, #tpu.memory_space<vmem>>, vector<2x16x256xf32>
    %33 = vector.broadcast %31 : vector<2x16x1xf32> to vector<2x16x256xf32>
    %34 = arith.mulf %32, %33 : vector<2x16x256xf32>
    %c0_11 = arith.constant 0 : index
    %c0_12 = arith.constant 0 : index
    %c0_13 = arith.constant 0 : index
    %35 = vector.load %arg3[%c0_11, %c0_12, %c0_13] : memref<2x16x256xf32, #tpu.memory_space<vmem>>, vector<2x16x256xf32>
    tpu.vector_store %arg3[%c0_11, %c0_12, %c0_13], %34 {strides = array<i32>} : memref<2x16x256xf32, #tpu.memory_space<vmem>>, vector<2x16x256xf32>,
    return
  }
  func.func @transform_0(%arg0: i32) -> i32 {
    %c0_i32 = arith.constant 0 : i32
    %c0_i32_0 = arith.constant 0 : i32
    return %c0_i32 : i32
  }
  func.func @transform_1(%arg0: i32) -> (i32, i32, i32) {
    %c0_i32 = arith.constant 0 : i32
    %c0_i32_0 = arith.constant 0 : i32
    %c0_i32_1 = arith.constant 0 : i32
    return %arg0, %c0_i32, %c0_i32_0 : i32, i32, i32
  }
  func.func @transform_2(%arg0: i32) -> (i32, i32, i32) {
    %c0_i32 = arith.constant 0 : i32
    %c0_i32_0 = arith.constant 0 : i32
    %c0_i32_1 = arith.constant 0 : i32
    return %arg0, %c0_i32, %c0_i32_0 : i32, i32, i32
  }
}

</mosaic_0001>

<bundles_post_ra>
// kernel: tpu_custom_call.1
= control target key start
LH: loop header
LB: loop body
LE: loop exit
PB: predicated region body
PF: predicated region fallthrough
CT: control target
= control target key end

     0   :  { %7 = vsyncpa [#allocation5], 0  ;;  %s367_s0 = inlined_call_operand.hbm [shape: f32[3], index: 0, kind: input, shape index: {}]   ;;  %s368_s1 = inlined_call_operand.hbm [shape: f32[2,16,256], index: 1, kind: input, shape index: {}]   ;;  %s369_s2 = inlined_call_operand.hbm [shape: f32[2,16,256], index: 2, kind: output, shape index: {}]  }
   0x1   :  { %8 = vsyncpa [#allocation3], 0 }
   0x2   :  { %9 = vsyncpa [#allocation4], 0  ;;  %s15_s11 = sshll.u32 %s367_s0, 4  ;;  %s23_s14 = sshll.u32 %s368_s1, 4  ;;  %s16_s11 = int_to_ptr.hbm [resolvable:$true] %s15_s11  ;;  %s24_s14 = int_to_ptr.hbm [resolvable:$true] %s23_s14 }
   0x3   :  { %s294_s15 = smov [#allocation2]   ;;  %s295_s16 = smov [#allocation6]  }
   0x4   :  { %18 = dma.hbm_to_smem %s16_s11, 16, %s294_s15, [#allocation5]  }
   0x5   :  { %s25_s17 = sshll.u32 %s295_s16, 4  ;;  %s296_s18 = smov 256   ;;  %s26_s17 = int_to_ptr.vmem [resolvable:$true] %s25_s17 }
   0x6   :  { %s297_s19 = smov 16  }
   0x7   :  { %31 = dma.hbm_to_vmem [thread:$0]  %s24_s14, 1024, %s26_s17, [#allocation3], %s296_s18, %s296_s18, %s297_s19  }
   0x8   :  { %288 = dma.done.wait [#allocation5], 16  }
   0x9   :  { %289 = vsyncadd [#allocation5], 4294967280 }
   0xa   :  { %290 = dma.done.wait [#allocation3], 1024  }
   0xb   :  { %291 = vsyncadd [#allocation3], 4294966272 }
   0xc   :  { %40 = sfence }
   0xd   :  { %v323_v0 = vld [vmem:[#allocation6 + $0x20] sm:$0xff]  ;;  %v325_v1 = vld [vmem:[#allocation6 + $0x28] sm:$0xff]  ;;  %v65_v3 = vlaneseq  ;;  %v335_v8 = vld [vmem:[#allocation6 + $0x30] sm:$0xff]  ;;  %s76_s0 = sld [smem:[#allocation2]]  ;;  %vm99_vm6 = vcmask 130112   ;;  %vm104_vm7 = vcmask 1041409  }
   0xe   :  { %v327_v2 = vld [vmem:[#allocation6] sm:$0xff]  ;;  %v55_v4 = vadd.f32 %v325_v1, %v323_v0  ;;  %v331_v5 = vld [vmem:[#allocation6 + $0x8] sm:$0xff]  ;;  %v337_v9 = vld [vmem:[#allocation6 + $0x38] sm:$0xff]  ;;  %s210_s1 = sld [smem:[#allocation2 + $0x1]]  ;;  %vm106_vm8 = vcmask 130048   ;;  %s298_s21 = smov [#allocation7]  }
   0xf   :  { %v49_v6 = vadd.f32 %v331_v5, %v327_v2  ;;  %v66_v7 = vshrl.u32 %v65_v3, 7  ;;  %v339_v10 = vld [vmem:[#allocation6 + $0x10] sm:$0xff]  ;;  %v341_v11 = vld [vmem:[#allocation6 + $0x18] sm:$0xff]  ;;  %v58_v12 = vadd.f32 %v337_v9, %v335_v8  ;;  %v69_v14 = vand.u32 127, %v65_v3  ;;  %s211_s20 = sld [smem:[#allocation2 + $0x2]]  ;;  %s194_s22 = sshll.u32 %s298_s21, 4  ;;  %s195_s22 = int_to_ptr.vmem [resolvable:$true] %s194_s22 }
  0x10   :  { %56 = vadd.xlane.f32.xlu1 %v55_v4  ;;  %v52_v13 = vadd.f32 %v341_v11, %v339_v10  ;;  %s196_s25 = sshll.u32 %s369_s2, 4  ;;  %s197_s25 = int_to_ptr.hbm [resolvable:$true] %s196_s25 }
  0x11   :  { %50 = vadd.xlane.f32.xlu0 %v49_v6  ;;  %219 = vset.pattern.permute.xlu2 %v66_v7  ;;  %v347_v15 = vadd.s32 8, %v66_v7  ;;  %v70_v18 = vsub.s32 %v66_v7, %v69_v14  ;;  %v97_v32 = vadd.s32 4294967288, %v69_v14 }
  0x12   :  { %221 = vset.pattern.permute.xlu0 %v66_v7 }
  0x13   :  { %v71_v16 = vsub.s32 %v347_v15, %v69_v14  ;;  %222 = vset.pattern.permute.xlu1 %v347_v15  ;;  %v77_v19 = vstv %s76_s0  ;;  %v72_v20 = vadd.s32 1, %v70_v18 }
  0x14   :  { %v83_v22 = vstv %s210_s1 }
  0x15   :  { %v73_v17 = vadd.s32 1, %v71_v16  ;;  %v89_v24 = vstv %s211_s20  ;;  %vm74_vm3 = vcmp.eq.s32.totalorder %v72_v20, 0  ;;  %vm80_vm4 = vcmp.eq.s32.totalorder %v72_v20, 1 }
  0x16   :  { %v78_v26 = vsel %vm74_vm3, %v77_v19, 0.0  ;;  %vm86_vm5 = vcmp.eq.s32.totalorder %v72_v20, 2 }
  0x17   :  { %vm75_vm0 = vcmp.eq.s32.totalorder %v73_v17, 0  ;;  %vm81_vm1 = vcmp.eq.s32.totalorder %v73_v17, 1  ;;  %vm87_vm2 = vcmp.eq.s32.totalorder %v73_v17, 2  ;;  %v84_v27 = vsel %vm80_vm4, %v83_v22, %v78_v26 }
  0x18   :  { %59 = vadd.xlane.f32.xlu1 %v58_v12  ;;  %v79_v21 = vsel %vm75_vm0, %v77_v19, 0.0  ;;  %v90_v28 = vsel %vm86_vm5, %v89_v24, %v84_v27 }
  0x19   :  { %53 = vadd.xlane.f32.xlu0 %v52_v13  ;;  %v85_v23 = vsel %vm81_vm1, %v83_v22, %v79_v21 }
  0x1a   :  { %v91_v25 = vsel %vm87_vm2, %v89_v24, %v85_v23 }
  0x1b   :  { %123 = vmatpush.msra.mxu0 %v91_v25 }
  0x1d   :  { %124 = vmatpush.msra.mxu0 %v90_v28 }
  0x83   :  { %v57_v29 = vpop.xlane.xlu1 %56 }
  0x84   :  { %v51_v30 = vpop.xlane.xlu0 %50  ;;  %v63_v31 = vmul.f32 0.00390625, %v57_v29 }
  0x85   :  { %v61_v33 = vmul.f32 0.00390625, %v51_v30 }
  0x86   :  { %v101_v38 = vperm.slane %v63_v31, %v69_v14 }
  0x87   :  { %v96_v40 = vperm.slane %v61_v33, %v69_v14 }
  0x8b   :  { %v60_v34 = vpop.xlane.xlu1 %59 }
  0x8c   :  { %v64_v35 = vmul.f32 0.00390625, %v60_v34  ;;  %v54_v36 = vpop.xlane.xlu0 %53 }
  0x8d   :  { %v62_v37 = vmul.f32 0.00390625, %v54_v36 }
  0x8e   :  { %v102_v39 = vperm.slane %v64_v35, %v97_v32 }
  0x8f   :  { %v98_v41 = vperm.slane %v62_v37, %v97_v32 }
  0x90   :  { %v103_v42 = vsel %vm99_vm6, %v102_v39, %v101_v38 }
  0x91   :  { %v100_v43 = vsel %vm99_vm6, %v98_v41, %v96_v40 }
  0x92   :  { %v105_v44 = vsel %vm104_vm7, %v103_v42, %v100_v43 }
  0x93   :  { %212 = vmatmul.msk.f32.vlgmr.msra.gmra.mxu0 %vm106_vm8, %v105_v44 }
 0x110   :  { %v126_v45 = vpop.f32.mrf.mxu0 }
 0x111   :  { %v213_v46 = vmul.f32 -1.442695, %v126_v45 }
 0x113   :  { %224 = vpow2.f32 %v213_v46 }
 0x119   :  { %v225_v47 = vpop.eup %224 }
 0x11a   :  { %v132_v48 = vadd.f32 1.0, %v225_v47 }
 0x11c   :  { %226 = vrcp.f32 %v132_v48  ;;  %v144_v52 = vand.u32 2147483648, %v132_v48  ;;  %v142_v54 = vand.u32 2147483647, %v132_v48  ;;  %vm138_vm10 = vweird.f32 %v132_v48 }
 0x11e   :  { %v145_v56 = vor.u32 1.1754944e-38, %v144_v52  ;;  %vm143_vm12 = vcmp.eq.f32.partialorder %v142_v54, 8.507059e+37 }
 0x122   :  { %v227_v49 = vpop.eup %226 }
 0x123   :  { %v134_v50 = vmul.f32 %v227_v49, %v132_v48  ;;  %vm139_vm9 = vweird.f32 %v227_v49 }
 0x124   :  { %vm140_vm11 = vmor %vm138_vm10, %vm139_vm9 }
 0x125   :  { %v135_v51 = vsub.f32 1.0, %v134_v50 }
 0x127   :  { %v136_v53 = vmul.f32 %v227_v49, %v135_v51 }
 0x129   :  { %v137_v55 = vadd.f32 %v227_v49, %v136_v53 }
 0x12b   :  { %v141_v57 = vsel %vm140_vm11, %v227_v49, %v137_v55 }
 0x12c   :  { %v146_v58 = vsel %vm143_vm12, %v145_v56, %v141_v57 }
 0x12d   :  { %v161_v59 = vperm.slane %v146_v58, 1  ;;  %v148_v60 = vperm.slane %v146_v58, 0 }
 0x12f   :  { %172 = vperm.xlu1 %222, %v161_v59   ;;  %166 = vperm.xlu0 %221, %v161_v59  }
 0x130   :  { %153 = vperm.xlu2 %219, %v148_v60  }
 0x137   :  { %223 = vset.pattern.permute.xlu0 %v347_v15 }
 0x138   :  { %220 = vset.pattern.permute.xlu2 %v347_v15 }
 0x140   :  { %159 = vperm.xlu2 %220, %v148_v60  }
 0x18a   :  { %v154_v61 = vpop.permute.xlu2 %153 }
 0x18b   :  { %v174_v62 = vmul.f32 %v154_v61, %v327_v2  ;;  %v175_v63 = vmul.f32 %v154_v61, %v331_v5 }
 0x18d   :  { %182 = vst [vmem:[#allocation7] sm:$0xff] %v174_v62 }
 0x18e   :  { %183 = vst [vmem:[#allocation7 + $0x8] sm:$0xff] %v175_v63 }
 0x19a   :  { %v160_v3 = vpop.permute.xlu2 %159 }
 0x19b   :  { %v176_v4 = vmul.f32 %v160_v3, %v339_v10  ;;  %v177_v6 = vmul.f32 %v160_v3, %v341_v11 }
 0x19d   :  { %184 = vst [vmem:[#allocation7 + $0x10] sm:$0xff] %v176_v4 }
 0x19e   :  { %185 = vst [vmem:[#allocation7 + $0x18] sm:$0xff] %v177_v6 }
 0x1a1   :  { %v173_v7 = vpop.permute.xlu1 %172  ;;  %v167_v12 = vpop.permute.xlu0 %166 }
 0x1a2   :  { %v180_v13 = vmul.f32 %v173_v7, %v335_v8  ;;  %v181_v14 = vmul.f32 %v173_v7, %v337_v9  ;;  %v178_v15 = vmul.f32 %v167_v12, %v323_v0  ;;  %v179_v2 = vmul.f32 %v167_v12, %v325_v1 }
 0x1a4   :  { %188 = vst [vmem:[#allocation7 + $0x30] sm:$0xff] %v180_v13 }
 0x1a5   :  { %189 = vst [vmem:[#allocation7 + $0x38] sm:$0xff] %v181_v14 }
 0x1a6   :  { %186 = vst [vmem:[#allocation7 + $0x20] sm:$0xff] %v178_v15 }
 0x1a7   :  { %187 = vst [vmem:[#allocation7 + $0x28] sm:$0xff] %v179_v2 }
 0x1a8   :  { %202 = dma.vmem_to_hbm [thread:$0]  %s195_s22, 1024, %s197_s25, [#allocation4], %s296_s18, %s296_s18, %s297_s19  }
 0x1a9   :  { %292 = dma.done.wait [#allocation4], 1024  }
 0x1aa   :  { %293 = vsyncadd [#allocation4], 4294966272 }
 0x1ab   :  { %207 = vsyncpa [#allocation3], 1 }
 0x1ac   :  { %208 = vsyncpa [#allocation4], 1 }
 0x1ad   :  { %209 = vsyncpa [#allocation5], 1 }

</bundles_post_ra>
